<compile_context>
chip_gen: v6e
topology: v6e:2x2x1
jax: 0.10.0
libtpu: 0.0.40
codegen_flags: <defaults>
</compile_context>

<pallas_src>
import math

import jax
import jax.numpy as jnp
from jax.experimental import pallas as pl
from jax.experimental.pallas import tpu as pltpu


def _time_mlp_kernel(time_ref, freqs_ref, w_sin_ref, w_cos_ref, bias_ref, out_ref):
    """One batch tile of TimeMLP.

    time_ref : [TB, 1]   f32  timesteps (one per row)
    freqs_ref: [1, H]    f32  precomputed frequency table
    w_sin_ref: [H, D]    f32  rows of W^T multiplying the sin half of the embedding
    w_cos_ref: [H, D]    f32  rows of W^T multiplying the cos half of the embedding
    bias_ref : [1, D]    f32  Linear bias
    out_ref  : [TB, D]   f32  ReLU(cat(sin, cos) @ W^T + b)
    """
    # (TB, 1) * (1, H) broadcast -> (TB, H); pure VPU work.
    args = time_ref[...] * freqs_ref[...]
    sin_e = jnp.sin(args)          # EUP
    cos_e = jnp.cos(args)          # EUP

    # cat(sin, cos) @ W^T == sin @ W^T[:H] + cos @ W^T[H:]  (no concatenate).
    acc = jnp.dot(sin_e, w_sin_ref[...], preferred_element_type=jnp.float32)
    acc = acc + jnp.dot(cos_e, w_cos_ref[...], preferred_element_type=jnp.float32)
    acc = acc + bias_ref[...]
    out_ref[...] = jnp.maximum(acc, 0.0).astype(out_ref.dtype)


def time_mlp_forward(time: jax.Array, weight: jax.Array, bias: jax.Array,
                     *, dim: int = 32, batch_block: int = 1024) -> jax.Array:
    """TimeMLP forward: time [B] -> [B, dim].

    weight: [dim, dim] in PyTorch nn.Linear layout (out_features, in_features).
    bias:   [dim].
    """
    assert dim % 2 == 0 and dim >= 4, "dim must be even and >= 4"
    half = dim // 2
    b = time.shape[0]

    # Frequency table: constant given `dim`; computed once here, not per tile.
    log_scale = math.log(10000.0) / (half - 1)
    freqs = jnp.exp(
        jnp.arange(half, dtype=jnp.float32) * (-log_scale)
    ).reshape(1, half)

    w_t = jnp.asarray(weight, jnp.float32).T           # [in=dim, out=dim]
    w_sin = w_t[:half, :]                               # [half, dim]
    w_cos = w_t[half:, :]                               # [half, dim]
    bias2 = jnp.asarray(bias, jnp.float32).reshape(1, dim)
    time2 = jnp.asarray(time, jnp.float32).reshape(b, 1)

    # Full block for small B (block == array dims sidesteps the (8,128) rule),
    # otherwise 1024-row blocks (multiple of 8 sublanes, tiny VMEM footprint).
    tb = b if b <= batch_block else batch_block
    grid = (pl.cdiv(b, tb),)

    return pl.pallas_call(
        _time_mlp_kernel,
        out_shape=jax.ShapeDtypeStruct((b, dim), jnp.float32),
        grid=grid,
        in_specs=[
            pl.BlockSpec((tb, 1), lambda i: (i, 0)),        # time tile
            pl.BlockSpec((1, half), lambda i: (0, 0)),      # freqs (resident)
            pl.BlockSpec((half, dim), lambda i: (0, 0)),    # W^T sin half (resident)
            pl.BlockSpec((half, dim), lambda i: (0, 0)),    # W^T cos half (resident)
            pl.BlockSpec((1, dim), lambda i: (0, 0)),       # bias (resident)
        ],
        out_specs=pl.BlockSpec((tb, dim), lambda i: (i, 0)),
        compiler_params=pltpu.CompilerParams(
            # Batch tiles are independent -> shard across TensorCores on v7x.
            dimension_semantics=("parallel",),
        ),
    )(time2, freqs, w_sin, w_cos, bias2)


def _reference_time_mlp(time: jax.Array, weight: jax.Array, bias: jax.Array,
                        dim: int) -> jax.Array:
    """Pure-JAX reference matching the PyTorch TimeMLP forward."""
    half = dim // 2
    scale = math.log(10000.0) / (half - 1)
    freqs = jnp.exp(jnp.arange(half, dtype=jnp.float32) * -scale)
    emb = time[:, None].astype(jnp.float32) * freqs[None, :]
    emb = jnp.concatenate((jnp.sin(emb), jnp.cos(emb)), axis=-1)
    return jnp.maximum(emb @ jnp.asarray(weight, jnp.float32).T
                       + jnp.asarray(bias, jnp.float32)[None, :], 0.0)


if __name__ == "__main__":
    key = jax.random.PRNGKey(0)
    k_t, k_w, k_b = jax.random.split(key, 3)

    batch = 8
    dim = 32  # TimeMLP.time_emb_dim

    # Diffusion-style timesteps in [0, 1000).
    time = jax.random.uniform(k_t, (batch,), jnp.float32, 0.0, 1000.0)
    # nn.Linear(dim, dim) parameters (PyTorch layout: [out, in]).
    weight = jax.random.normal(k_w, (dim, dim), jnp.float32) * (1.0 / math.sqrt(dim))
    bias = jax.random.normal(k_b, (dim,), jnp.float32) * 0.1

    out = time_mlp_forward(time, weight, bias, dim=dim)
    out = jax.block_until_ready(out)

    ref = _reference_time_mlp(time, weight, bias, dim)
    assert out.shape == (batch, dim)
    # Loose-ish tolerance: the in-kernel MXU dot and XLA's reference dot may use
    # different default f32 matmul precision policies.
    assert jnp.allclose(out, ref, atol=2e-2, rtol=2e-2), "mismatch vs reference"
    print("KERNEL_OK")
</pallas_src>

<mosaic_0001>
module attributes {stable_mosaic.version = 11 : i64} {
  func.func @_time_mlp_kernel(%arg0: i32, %arg1: memref<8x1xf32, #tpu.memory_space<vmem>>, %arg2: memref<1x16xf32, #tpu.memory_space<vmem>>, %arg3: memref<16x32xf32, #tpu.memory_space<vmem>>, %arg4: memref<16x32xf32, #tpu.memory_space<vmem>>, %arg5: memref<1x32xf32, #tpu.memory_space<vmem>>, %arg6: memref<8x32xf32, #tpu.memory_space<vmem>>) attributes {dimension_semantics = [#tpu.dimension_semantics<parallel>], iteration_bounds = array<i64: 1>, scalar_prefetch = 0 : i64, scratch_operands = 0 : i64, tpu.core_type = #tpu.core_type<tc>, window_params = [{transform_indices = @transform_0, window_bounds = array<i64: 8, 1>}, {pipeline_mode = #tpu.pipeline_mode<synchronous>, transform_indices = @transform_1, window_bounds = array<i64: 1, 16>}, {pipeline_mode = #tpu.pipeline_mode<synchronous>, transform_indices = @transform_2, window_bounds = array<i64: 16, 32>}, {pipeline_mode = #tpu.pipeline_mode<synchronous>, transform_indices = @transform_3, window_bounds = array<i64: 16, 32>}, {pipeline_mode = #tpu.pipeline_mode<synchronous>, transform_indices = @transform_4, window_bounds = array<i64: 1, 32>}, {transform_indices = @transform_5, window_bounds = array<i64: 8, 32>}]} {
    %c0 = arith.constant 0 : index
    %c0_0 = arith.constant 0 : index
    %0 = vector.load %arg1[%c0, %c0_0] : memref<8x1xf32, #tpu.memory_space<vmem>>, vector<8x1xf32>
    %c0_1 = arith.constant 0 : index
    %c0_2 = arith.constant 0 : index
    %1 = vector.load %arg2[%c0_1, %c0_2] : memref<1x16xf32, #tpu.memory_space<vmem>>, vector<1x16xf32>
    %2 = vector.broadcast %0 : vector<8x1xf32> to vector<8x16xf32>
    %3 = vector.broadcast %1 : vector<1x16xf32> to vector<8x16xf32>
    %4 = arith.mulf %2, %3 : vector<8x16xf32>
    %5 = math.sin %4 : vector<8x16xf32>
    %6 = math.cos %4 : vector<8x16xf32>
    %c0_3 = arith.constant 0 : index
    %c0_4 = arith.constant 0 : index
    %7 = vector.load %arg3[%c0_3, %c0_4] : memref<16x32xf32, #tpu.memory_space<vmem>>, vector<16x32xf32>
    %cst = arith.constant dense<0.000000e+00> : vector<8x32xf32>
    %8 = tpu.matmul %5, %7, %cst {dimension_numbers = #tpu.dot_dimension_numbers<[1], [0], [0], [1], [0, 0, 1, 1], [], []>} : vector<8x16xf32>, vector<16x32xf32>, vector<8x32xf32> -> vector<8x32xf32>
    %c0_5 = arith.constant 0 : index
    %c0_6 = arith.constant 0 : index
    %9 = vector.load %arg4[%c0_5, %c0_6] : memref<16x32xf32, #tpu.memory_space<vmem>>, vector<16x32xf32>
    %cst_7 = arith.constant dense<0.000000e+00> : vector<8x32xf32>
    %10 = tpu.matmul %6, %9, %cst_7 {dimension_numbers = #tpu.dot_dimension_numbers<[1], [0], [0], [1], [0, 0, 1, 1], [], []>} : vector<8x16xf32>, vector<16x32xf32>, vector<8x32xf32> -> vector<8x32xf32>
    %11 = arith.addf %8, %10 : vector<8x32xf32>
    %c0_8 = arith.constant 0 : index
    %c0_9 = arith.constant 0 : index
    %12 = vector.load %arg5[%c0_8, %c0_9] : memref<1x32xf32, #tpu.memory_space<vmem>>, vector<1x32xf32>
    %13 = vector.broadcast %12 : vector<1x32xf32> to vector<8x32xf32>
    %14 = arith.addf %11, %13 : vector<8x32xf32>
    %cst_10 = arith.constant 0.000000e+00 : f32
    %15 = vector.broadcast %cst_10 : f32 to vector<8x32xf32>
    %16 = arith.maximumf %14, %15 : vector<8x32xf32>
    %c0_11 = arith.constant 0 : index
    %c0_12 = arith.constant 0 : index
    %17 = vector.load %arg6[%c0_11, %c0_12] : memref<8x32xf32, #tpu.memory_space<vmem>>, vector<8x32xf32>
    tpu.vector_store %arg6[%c0_11, %c0_12], %16 {strides = array<i32>} : memref<8x32xf32, #tpu.memory_space<vmem>>, vector<8x32xf32>,
    return
  }
  func.func @transform_0(%arg0: i32) -> (i32, i32) {
    %c0_i32 = arith.constant 0 : i32
    %c0_i32_0 = arith.constant 0 : i32
    return %arg0, %c0_i32 : i32, i32
  }
  func.func @transform_1(%arg0: i32) -> (i32, i32) {
    %c0_i32 = arith.constant 0 : i32
    %c0_i32_0 = arith.constant 0 : i32
    %c0_i32_1 = arith.constant 0 : i32
    return %c0_i32, %c0_i32_0 : i32, i32
  }
  func.func @transform_2(%arg0: i32) -> (i32, i32) {
    %c0_i32 = arith.constant 0 : i32
    %c0_i32_0 = arith.constant 0 : i32
    %c0_i32_1 = arith.constant 0 : i32
    return %c0_i32, %c0_i32_0 : i32, i32
  }
  func.func @transform_3(%arg0: i32) -> (i32, i32) {
    %c0_i32 = arith.constant 0 : i32
    %c0_i32_0 = arith.constant 0 : i32
    %c0_i32_1 = arith.constant 0 : i32
    return %c0_i32, %c0_i32_0 : i32, i32
  }
  func.func @transform_4(%arg0: i32) -> (i32, i32) {
    %c0_i32 = arith.constant 0 : i32
    %c0_i32_0 = arith.constant 0 : i32
    %c0_i32_1 = arith.constant 0 : i32
    return %c0_i32, %c0_i32_0 : i32, i32
  }
  func.func @transform_5(%arg0: i32) -> (i32, i32) {
    %c0_i32 = arith.constant 0 : i32
    %c0_i32_0 = arith.constant 0 : i32
    return %arg0, %c0_i32 : i32, i32
  }
}

</mosaic_0001>

<bundles_post_ra>
// kernel: tpu_custom_call.1
= control target key start
LH: loop header
LB: loop body
LE: loop exit
PB: predicated region body
PF: predicated region fallthrough
CT: control target
= control target key end

     0   :  { %10 = vsyncpa [#allocation3], 0  ;;  %s654_s0 = inlined_call_operand.vmem [shape: f32[8,1], index: 0, kind: input, shape index: {}]   ;;  %s655_s1 = inlined_call_operand.vmem [shape: f32[1,16], index: 1, kind: input, shape index: {}]   ;;  %s656_s2 = inlined_call_operand.hbm [shape: f32[16,32], index: 2, kind: input, shape index: {}]   ;;  %s657_s3 = inlined_call_operand.hbm [shape: f32[16,32], index: 3, kind: input, shape index: {}]   ;;  %s658_s4 = inlined_call_operand.vmem [shape: f32[1,32], index: 4, kind: input, shape index: {}]   ;;  %s659_s5 = inlined_call_operand.hbm [shape: f32[8,32], index: 5, kind: output, shape index: {}]  }
   0x1   :  { %11 = vsyncpa [#allocation6], 0 }
   0x2   :  { %12 = vsyncpa [#allocation4], 0  ;;  %s569_s18 = smov [#allocation2]  }
   0x3   :  { %s22_s19 = sshll.u32 %s569_s18, 4  ;;  %s23_s19 = int_to_ptr.vmem [resolvable:$true] %s22_s19 }
   0x4   :  { %s511_s20 = scalar_lea.vmem %s23_s19, 256  ;;  %p516_p1 = scmp.lt.s32.totalorder %s23_s19, %s23_s19 }
   0x5   :  { %p512_p0 = scmp.ne.s32.totalorder %s23_s19, %s511_s20  ;;  %p517_p2 = scmp.lt.s32.totalorder %s511_s20, %s511_s20 }
   0x7   :  { %p518_p3 = por %p517_p2, %p516_p1 }
   0x9   :  { %p519_p4 = pnand %p518_p3, %p512_p0 }
   0xb   :  { %522 = shalt.err (!%p519_p4)
}
   0xc   :  { %s570_s21 = smov 128   ;;  %s571_s22 = smov 8  }
   0xd   :  { %28 = dma.hbm_to_vmem [thread:$0]  %s656_s2, 256, %s23_s19, [#allocation3], %s570_s21, %s570_s21, %s571_s22  }
   0xe   :  { %s572_s25 = smov [#allocation5]  }
   0xf   :  { %s34_s26 = sshll.u32 %s572_s25, 4  ;;  %s35_s26 = int_to_ptr.vmem [resolvable:$true] %s34_s26 }
  0x10   :  { %s531_s27 = scalar_lea.vmem %s35_s26, 256  ;;  %p536_p6 = scmp.lt.s32.totalorder %s35_s26, %s35_s26 }
  0x11   :  { %p532_p5 = scmp.ne.s32.totalorder %s35_s26, %s531_s27  ;;  %p537_p7 = scmp.lt.s32.totalorder %s531_s27, %s531_s27 }
  0x13   :  { %p538_p8 = por %p537_p7, %p536_p6 }
  0x15   :  { %p539_p9 = pnand %p538_p8, %p532_p5 }
  0x17   :  { %542 = shalt.err (!%p539_p9)
}
  0x18   :  { %40 = dma.hbm_to_vmem [thread:$0]  %s657_s3, 256, %s35_s26, [#allocation6], %s570_s21, %s570_s21, %s571_s22  }
  0x19   :  { %563 = dma.done.wait [#allocation3], 256  }
  0x1a   :  { %564 = vsyncadd [#allocation3], 4294967040 }
  0x1b   :  { %565 = dma.done.wait [#allocation6], 256  }
  0x1c   :  { %566 = vsyncadd [#allocation6], 4294967040  ;;  %v573_v0 = vmov 0   ;;  %v49_v1 = vld [vmem:[%s654_s0] sm:$0xff]  ;;  %v273_v2 = vld [vmem:[#allocation5 + $0x8] sm:$0xff]  ;;  %v574_v4 = vmov 0.0  }
  0x1d   :  { %498 = vset.pattern.permute.xlu0 %v573_v0  ;;  %v271_v3 = vld [vmem:[#allocation2 + $0x8] sm:$0xff]  ;;  %466 = vmatprep.subr.mxu0 %v574_v4  ;;  %v272_v5 = vld [vmem:[#allocation5] sm:$0xff]  ;;  %v270_v6 = vld [vmem:[#allocation2] sm:$0xff]  ;;  %vm575_vm0 = vmmov 0   ;;  %v576_v20 = vmov 683565275  }
  0x1e   :  { %53 = vperm.xlu0 %498, %v49_v1   ;;  %473 = vmatprep.subr.mxu1 %v574_v4  ;;  %v448_v7 = vld [vmem:[%s655_s1] ss:$0 sm:$0xff]  ;;  %v577_v22 = vmov 2475754826   ;;  %v578_v25 = vmov 2131351028  }
  0x1f   :  { %467 = vmatpush3.msra.mxu0 %v273_v2  ;;  %474 = vmatpush3.msra.mxu1 %v271_v3  ;;  %v579_v28 = vmov 2102212464   ;;  %v580_v31 = vmov 920167782   ;;  %v581_v34 = vmov 1326507024  }
  0x20   :  { %468 = vmatprep.subr.mxu0 %v574_v4  ;;  %475 = vmatprep.subr.mxu1 %v574_v4  ;;  %vm274_vm11 = vcmask 130048   ;;  %s582_s7 = smov [#allocation7]  }
  0x21   :  { %469 = vmatpush3.msra.mxu0 %v272_v5  ;;  %470 = vmatprep.mubr.msk.f32.mxu0 %vm575_vm0, %v574_v4  ;;  %s438_s8 = sshll.u32 %s582_s7, 4  ;;  %s439_s8 = int_to_ptr.vmem [resolvable:$true] %s438_s8 }
  0x22   :  { %476 = vmatpush3.msra.mxu1 %v270_v6  ;;  %477 = vmatprep.mubr.msk.f32.mxu1 %vm575_vm0, %v574_v4  ;;  %s543_s9 = scalar_lea.vmem %s439_s8, 128  ;;  %p548_p11 = scmp.lt.s32.totalorder %s439_s8, %s439_s8 }
  0x23   :  { %p544_p10 = scmp.ne.s32.totalorder %s439_s8, %s543_s9  ;;  %p549_p12 = scmp.lt.s32.totalorder %s543_s9, %s543_s9 }
  0x25   :  { %p550_p13 = por %p549_p12, %p548_p11 }
  0x27   :  { %p551_p0 = pnand %p550_p13, %p544_p10 }
  0x99   :  { %v54_v8 = vpop.permute.xlu0 %53 }
  0x9a   :  { %v625_v9 = vmul.f32 %v448_v7, %v54_v8 }
  0x9c   :  { %v66_v10 = vand.u32 2139095040, %v625_v9  ;;  %v63_v14 = vand.u32 2147483647, %v625_v9  ;;  %vm65_vm8 = vcmp.lt.s32.totalorder %v625_v9, 0 }
  0x9e   :  { %v67_v11 = vshrl.u32 %v66_v10, 23  ;;  %v70_v17 = vand.u32 8388607, %v63_v14  ;;  %vm64_vm9 = vcmp.le.f32.partialorder %v63_v14, 0.7853982 }
  0xa0   :  { %v449_v12 = vadd.s32 4294967169, %v67_v11  ;;  %v71_v36 = vor.u32 8388608, %v70_v17 }
  0xa2   :  { %v73_v13 = vadd.s32 1, %v449_v12  ;;  %v111_v50 = vshll.u32 %v71_v36, 8 }
  0xa4   :  { %vm74_vm1 = vcmp.gt.s32.totalorder %v73_v13, 0 }
  0xa5   :  { %v75_v15 = vsel %vm74_vm1, %v73_v13, 0  ;;  %vm155_vm1 = vweird.f32 %v625_v9 }
  0xa6   :  { %v77_v16 = vand.u32 31, %v75_v15  ;;  %v76_v19 = vshrl.u32 %v75_v15, 5 }
  0xa8   :  { %v78_v18 = vsub.s32 32, %v77_v16  ;;  %v80_v21 = vshll.u32 %v576_v20, %v77_v16  ;;  %v83_v23 = vshll.u32 %v577_v22, %v77_v16  ;;  %v86_v27 = vshll.u32 %v578_v25, %v77_v16 }
  0xa9   :  { %v89_v30 = vshll.u32 %v579_v28, %v77_v16  ;;  %v92_v33 = vshll.u32 %v580_v31, %v77_v16  ;;  %vm95_vm2 = vcmp.lt.s32.totalorder %v76_v19, 1  ;;  %vm98_vm3 = vcmp.lt.s32.totalorder %v76_v19, 4 }
  0xaa   :  { %v81_v24 = vshrl.u32 %v577_v22, %v78_v18  ;;  %v84_v26 = vshrl.u32 %v578_v25, %v78_v18  ;;  %v87_v29 = vshrl.u32 %v579_v28, %v78_v18  ;;  %v90_v32 = vshrl.u32 %v580_v31, %v78_v18 }
  0xab   :  { %v93_v35 = vshrl.u32 %v581_v34, %v78_v18  ;;  %v79_v45 = vshrl.u32 %v576_v20, %v78_v18  ;;  %vm97_vm4 = vcmp.lt.s32.totalorder %v76_v19, 3  ;;  %vm96_vm5 = vcmp.lt.s32.totalorder %v76_v19, 2 }
  0xac   :  { %v82_v37 = vor.u32 %v81_v24, %v80_v21  ;;  %v85_v38 = vor.u32 %v84_v26, %v83_v23  ;;  %v88_v39 = vor.u32 %v87_v29, %v86_v27  ;;  %v91_v40 = vor.u32 %v90_v32, %v89_v30 }
  0xad   :  { %v94_v41 = vor.u32 %v93_v35, %v92_v33 }
  0xae   :  { %v100_v42 = vsel %vm98_vm3, %v88_v39, 2102212464  ;;  %v103_v43 = vsel %vm95_vm2, %v82_v37, %v85_v38  ;;  %v107_v44 = vsel %vm95_vm2, %v85_v38, %v88_v39  ;;  %v104_v46 = vsel %vm98_vm3, %v91_v40, 920167782 }
  0xaf   :  { %v108_v47 = vsel %vm98_vm3, %v94_v41, 1326507024  ;;  %v105_v48 = vsel %vm97_vm4, %v88_v39, %v104_v46  ;;  %v99_v51 = vsel %vm95_vm2, %v79_v45, %v82_v37  ;;  %v101_v52 = vsel %vm97_vm4, %v85_v38, %v100_v42  ;;  %v459_v45 = vld [vmem:[%s658_s4] ss:$0 sm:$0xff] }
  0xb0   :  { %v109_v49 = vsel %vm97_vm4, %v91_v40, %v108_v47  ;;  %v106_v53 = vsel %vm96_vm5, %v103_v43, %v105_v48  ;;  %v102_v59 = vsel %vm96_vm5, %v99_v51, %v101_v52  ;;  %vm430_vm2 = vcmask 261120  }
  0xb1   :  { %v110_v54 = vsel %vm96_vm5, %v107_v44, %v109_v49  ;;  %v634_v57 = vmul.u32.u64.low %v111_v50, %v106_v53  ;;  %v635_v58 = vmul.u32.u64.high %v111_v50, %v106_v53, %v634_v57  ;;  %v118_v61 = vmul.u32 %v111_v50, %v102_v59 }
  0xb2   :  { %v631_v55 = vmul.u32.u64.low %v111_v50, %v110_v54  ;;  %v632_v56 = vmul.u32.u64.high %v111_v50, %v110_v54, %v631_v55 }
  0xb3   :  { %v121_v60 = vadd.s32 1, %v635_v58 }
  0xb4   :  { %vm120_vm6 = vc.u32 %v632_v56, %v634_v57  ;;  %v119_v10 = vadd.s32 %v634_v57, %v632_v56 }
  0xb5   :  { %v122_v62 = vsel %vm120_vm6, %v121_v60, %v635_v58 }
  0xb6   :  { %v123_v63 = vadd.s32 %v122_v62, %v118_v61 }
  0xb8   :  { %v124_v0 = vadd.s32 536870912, %v123_v63 }
  0xba   :  { %v125_v1 = vshrl.u32 %v124_v0, 30 }
  0xbc   :  { %v126_v2 = vshll.u32 %v125_v1, 30  ;;  %v149_v24 = vsub.s32 4, %v125_v1 }
  0xbe   :  { %v127_v3 = vsub.s32 %v123_v63, %v126_v2  ;;  %v150_v27 = vsel %vm65_vm8, %v149_v24, %v125_v1 }
  0xbf   :  { %v152_v28 = vsel %vm64_vm9, 0, %v150_v27 }
  0xc0   :  { %v129_v4 = vsub.s32 0, %v127_v3  ;;  %v156_v29 = vadd.s32 3, %v152_v28  ;;  %v260_v30 = vand.u32 3, %v152_v28 }
  0xc2   :  { %v450_v5 = vmin.u32 %v129_v4, %v127_v3  ;;  %v157_v31 = vand.u32 3, %v156_v29  ;;  %vm265_vm10 = vcmp.eq.s32.totalorder %v260_v30, 2  ;;  %vm262_vm13 = vcmp.eq.s32.totalorder %v260_v30, 0 }
  0xc3   :  { %vm261_vm15 = vcmp.lt.s32.totalorder %v260_v30, 2 }
  0xc4   :  { %v131_v6 = vclz %v450_v5  ;;  %vm162_vm12 = vcmp.eq.s32.totalorder %v157_v31, 2  ;;  %vm159_vm14 = vcmp.eq.s32.totalorder %v157_v31, 0  ;;  %vm158_vm0 = vcmp.lt.s32.totalorder %v157_v31, 2 }
  0xc6   :  { %v451_v7 = vadd.s32 4294967294, %v131_v6 }
  0xc8   :  { %vm452_vm7 = vcmp.lt.s32.totalorder %v451_v7, 0 }
  0xc9   :  { %v134_v8 = vsel %vm452_vm7, 0, %v451_v7 }
  0xca   :  { %v135_v11 = vsub.s32 32, %v134_v8  ;;  %v139_v12 = vsub.s32 4294967266, %v134_v8  ;;  %v136_v13 = vshll.u32 %v127_v3, %v134_v8 }
  0xcc   :  { %v137_v15 = vshrl.u32 %v119_v10, %v135_v11  ;;  %v140_v16 = vadd.s32 127, %v139_v12 }
  0xce   :  { %v138_v17 = vor.u32 %v137_v15, %v136_v13  ;;  %v141_v18 = vshll.u32 %v140_v16, 23 }
  0xd0   :  { %v142_v19 = vor.u32 4788187, %v141_v18  ;;  %v145_v21 = vcvt.s32.f32 %v138_v17 }
  0xd2   :  { %v143_v20 = vand.u32 2147483647, %v142_v19 }
  0xd4   :  { %v146_v22 = vmul.f32 %v145_v21, %v143_v20 }
  0xd6   :  { %v147_v23 = vxor.u32 2147483648, %v146_v22 }
  0xd8   :  { %v148_v25 = vsel %vm65_vm8, %v147_v23, %v146_v22 }
  0xd9   :  { %v151_v26 = vsel %vm64_vm9, %v625_v9, %v148_v25 }
  0xda   :  { %499 = vcosq.f32 %v151_v26 }
  0xdb   :  { %501 = vsinq.f32 %v151_v26 }
  0xe7   :  { %v500_v32 = vpop.eup %499 }
  0xe8   :  { %v502_v33 = vpop.eup %501  ;;  %v163_v34 = vxor.u32 2147483648, %v500_v32 }
  0xe9   :  { %v160_v35 = vxor.u32 2147483648, %v502_v33 }
  0xea   :  { %v267_v36 = vsel %vm265_vm10, %v163_v34, %v502_v33  ;;  %v164_v14 = vsel %vm162_vm12, %v163_v34, %v502_v33 }
  0xeb   :  { %v264_v37 = vsel %vm262_vm13, %v500_v32, %v160_v35  ;;  %v161_v38 = vsel %vm159_vm14, %v500_v32, %v160_v35 }
  0xec   :  { %v268_v39 = vsel %vm261_vm15, %v264_v37, %v267_v36  ;;  %v165_v40 = vsel %vm158_vm0, %v161_v38, %v164_v14 }
  0xed   :  { %v269_v41 = vsel %vm155_vm1, nan, %v268_v39  ;;  %v166_v42 = vsel %vm155_vm1, nan, %v165_v40 }
  0xee   :  { %471 = vmatmul.mubr.msk.f32.vlgmr.msra.gmra.mxu0 %vm274_vm11, %v269_v41  ;;  %478 = vmatmul.mubr.msk.f32.vlgmr.msra.gmra.mxu1 %vm274_vm11, %v166_v42 }
 0x1ae   :  { %v344_v43 = vpop.f32.mrf.mxu0  ;;  %v417_v44 = vpop.f32.mrf.mxu1 }
 0x1af   :  { %v418_v46 = vadd.f32 %v417_v44, %v344_v43 }
 0x1b0   :  { %v472_v47 = vpop.f32.mrf.mxu0  ;;  %v479_v48 = vpop.f32.mrf.mxu1 }
 0x1b1   :  { %v428_v9 = vadd.f32 %v459_v45, %v418_v46 }
 0x1b3   :  { %v429_v49 = vmax.f32 %v428_v9, 0.0 }
 0x1b5   :  { %431 = vst.msk [vmem:[#allocation7] sm:$0xff] %vm430_vm2, %v429_v49 }
 0x1b6   :  { %554 = shalt.err (!%p551_p0)
}
 0x1b7   :  { %441 = dma.vmem_to_hbm [thread:$0]  %s439_s8, 128, %s659_s5, [#allocation4]  }
 0x1b8   :  { %567 = dma.done.wait [#allocation4], 128  }
 0x1b9   :  { %568 = vsyncadd [#allocation4], 4294967168 }
 0x1ba   :  { %445 = vsyncpa [#allocation3], 1 }
 0x1bb   :  { %446 = vsyncpa [#allocation6], 1 }
 0x1bc   :  { %447 = vsyncpa [#allocation4], 1 }

</bundles_post_ra>
